<compile_context>
chip_gen: v7x
topology: tpu7x:2x2x1
jax: 0.10.0
libtpu: 0.0.40
codegen_flags: <defaults>
</compile_context>

<pallas_src>
import jax
import jax.numpy as jnp
from jax.experimental import pallas as pl
from jax.experimental.pallas import tpu as pltpu


def _round_up(x, m):
    return (x + m - 1) // m * m


def _vmem_limit_bytes():
    cap = 64 * 1024 * 1024  # conservative fallback == v7x physical VMEM per TC
    try:
        cap = int(pltpu.get_tpu_info().vmem_capacity_bytes)
    except Exception:
        pass
    # leave ~25% headroom for compiler scratch; never request more than 100 MiB
    return min(cap * 3 // 4, 100 * 1024 * 1024)


def _choose_tiles(n):
    """Row tile tm and contraction (source-node) tile tk; tk a multiple of tm."""
    n128 = _round_up(max(n, 1), 128)
    tm = min(256, n128)       # MXU-aligned on v5e (128) and v6e/v7x (256)
    tk = min(1024, n128)      # deep K tile amortizes the ~0.35us/grid-step cost
    tk = _round_up(tk, tm)    # keeps padded col count a multiple of tm too
    return tm, tk


def _make_gcn_kernel(deg_col):
    def kernel(a_ref, xw_ref, xw_row_ref, b_ref, o_ref, acc_ref):
        # a_ref:      (tm, tk)   bf16 0/1 adjacency block (dest rows, src cols)
        # xw_ref:     (tk, fc_p) bf16 X@W^T rows of this K block (+ ones col)
        # xw_row_ref: (tm, fc_p) bf16 X@W^T rows of THIS row tile (fallback)
        # b_ref:      (1, fc_p)  f32 bias
        # o_ref:      (tm, fc_p) f32 output tile
        # acc_ref:    (tm, fc_p) f32 accumulator scratch
        k = pl.program_id(1)

        @pl.when(k == 0)
        def _():
            acc_ref[...] = jnp.zeros_like(acc_ref)

        # bf16 x bf16 -> f32 accumulation on the MXU; the ones-column of XW
        # makes acc[:, deg_col] accumulate the exact in-degree of each row.
        acc_ref[...] += jnp.dot(a_ref[...], xw_ref[...],
                                preferred_element_type=jnp.float32)

        @pl.when(k == pl.num_programs(1) - 1)
        def _():
            acc = acc_ref[...]
            deg = acc[:, deg_col:deg_col + 1]                   # (tm, 1), exact
            inv_deg = pl.reciprocal(jnp.maximum(deg, 1.0), approx=True)
            # mean over in-neighbors; nodes with no in-edges keep x @ W^T.
            h = jnp.where(deg > 0.0, acc * inv_deg,
                          xw_row_ref[...].astype(jnp.float32))
            o_ref[...] = h + b_ref[...]

    return kernel


def gcn_layer(adj, x, weight, bias):
    """
    adj:    (N, N) adj[i, j] = 1.0 iff edge j -> i exists. Values must be 0/1
            (bf16 storage is exact for 0/1; weighted adjacency would round).
    x:      (N, in_feats) node features
    weight: (out_feats, in_feats)  (PyTorch nn.Linear layout)
    bias:   (out_feats,)
    returns (N, out_feats) float32
    """
    n = x.shape[0]
    out_feats = weight.shape[0]

    tm, tk = _choose_tiles(n)
    n_rows_p = _round_up(n, tm)      # destination-node (row) padding
    n_cols_p = _round_up(n, tk)      # source-node (contraction) padding
    deg_col = out_feats              # ones-column sits in the lane padding
    fc_p = _round_up(out_feats + 1, 128)

    # ---- adjacency: bf16, padded (skip the N^2 copy if already prepared) ----
    if adj.shape == (n_rows_p, n_cols_p) and adj.dtype == jnp.bfloat16:
        a_pad = adj
    else:
        a_pad = jnp.zeros((n_rows_p, n_cols_p), jnp.bfloat16)
        a_pad = a_pad.at[:n, :n].set(adj.astype(jnp.bfloat16))

    # ---- projection X @ W^T once (cheap, N*in*out), aggregated in-kernel ----
    # TODO(synk): if out_feats >> in_feats, aggregate X instead and apply W in
    # the kernel epilogue (the reordering only helps when out_feats < in_feats).
    xw = jnp.dot(x.astype(jnp.float32), weight.T.astype(jnp.float32))
    xw_pad = jnp.zeros((n_cols_p, fc_p), jnp.bfloat16)
    xw_pad = xw_pad.at[:n, :out_feats].set(xw.astype(jnp.bfloat16))
    xw_pad = xw_pad.at[:n, deg_col].set(jnp.ones((n,), jnp.bfloat16))

    b_pad = jnp.zeros((1, fc_p), jnp.float32)
    b_pad = b_pad.at[0, :out_feats].set(bias.astype(jnp.float32))

    grid = (n_rows_p // tm, n_cols_p // tk)

    cost = pl.CostEstimate(
        flops=int(2 * n_rows_p * n_cols_p * fc_p),
        transcendentals=0,
        bytes_accessed=int(a_pad.size * 2                      # A read once
                           + xw_pad.size * 2 * grid[0]         # XW per row tile
                           + n_rows_p * fc_p * (2 + 4)         # fallback + out
                           + b_pad.size * 4),
    )

    out = pl.pallas_call(
        _make_gcn_kernel(deg_col),
        out_shape=jax.ShapeDtypeStruct((n_rows_p, fc_p), jnp.float32),
        grid=grid,
        in_specs=[
            pl.BlockSpec((tm, tk), lambda i, k: (i, k)),       # A block
            pl.BlockSpec((tk, fc_p), lambda i, k: (k, 0)),     # XW K block
            pl.BlockSpec((tm, fc_p), lambda i, k: (i, 0)),     # XW fallback rows
            pl.BlockSpec((1, fc_p), lambda i, k: (0, 0)),      # bias (resident)
        ],
        out_specs=pl.BlockSpec((tm, fc_p), lambda i, k: (i, 0)),
        scratch_shapes=[pltpu.VMEM((tm, fc_p), jnp.float32)],
        compiler_params=pltpu.CompilerParams(
            dimension_semantics=("parallel", "arbitrary"),
            vmem_limit_bytes=_vmem_limit_bytes(),
        ),
        cost_estimate=cost,
    )(a_pad, xw_pad, xw_pad, b_pad)

    # TODO(synk): for genuinely sparse graphs, replace the dense A@XW with a
    # CSR/edge-list gather-accumulate via PrefetchScalarGridSpec.
    # TODO(synk): on v7x, storing A as fp8 (0/1 exact) would halve HBM bytes again.
    return out[:n, :out_feats]


if __name__ == "__main__":
    key = jax.random.PRNGKey(0)
    k_x, k_adj, k_w, k_b = jax.random.split(key, 4)

    N = 16          # number of graph nodes
    IN_FEATS = 32
    OUT_FEATS = 16

    # Deterministic node features.
    x = jax.random.normal(k_x, (N, IN_FEATS), dtype=jnp.float32)

    # Deterministic random directed graph (dense 0/1 adjacency, no self loops).
    adj = (jax.random.uniform(k_adj, (N, N)) < 0.3).astype(jnp.float32)
    adj = adj * (1.0 - jnp.eye(N, dtype=jnp.float32))

    # nn.Linear(in_feats, out_feats) init: U(-1/sqrt(in), 1/sqrt(in)).
    bound = 1.0 / (IN_FEATS ** 0.5)
    weight = jax.random.uniform(
        k_w, (OUT_FEATS, IN_FEATS), minval=-bound, maxval=bound, dtype=jnp.float32
    )
    bias = jax.random.uniform(
        k_b, (OUT_FEATS,), minval=-bound, maxval=bound, dtype=jnp.float32
    )

    out = gcn_layer(adj, x, weight, bias)
    jax.block_until_ready(out)

    # Pure-JAX f32 reference (same semantics as the DGL module).
    deg = jnp.sum(adj, axis=1, keepdims=True)
    h = jnp.where(deg > 0, (adj @ x) / jnp.maximum(deg, 1.0), x)
    ref = h @ weight.T + bias

    # bf16 aggregation path -> relaxed tolerance vs. the exact f32 reference.
    assert jnp.allclose(out, ref, atol=3e-2, rtol=3e-2), "mismatch vs reference"

    print("KERNEL_OK")
</pallas_src>

<mosaic_0001>
module attributes {stable_mosaic.version = 11 : i64} {
  func.func @kernel(%arg0: i32, %arg1: i32, %arg2: memref<128x128xbf16, #tpu.memory_space<vmem>>, %arg3: memref<128x128xbf16, #tpu.memory_space<vmem>>, %arg4: memref<128x128xbf16, #tpu.memory_space<vmem>>, %arg5: memref<1x128xf32, #tpu.memory_space<vmem>>, %arg6: memref<128x128xf32, #tpu.memory_space<vmem>>, %arg7: memref<128x128xf32, #tpu.memory_space<vmem>>) attributes {dimension_semantics = [#tpu.dimension_semantics<parallel>, #tpu.dimension_semantics<arbitrary>], iteration_bounds = array<i64: 1, 1>, scalar_prefetch = 0 : i64, scratch_operands = 1 : i64, tpu.core_type = #tpu.core_type<tc>, window_params = [{transform_indices = @transform_0, window_bounds = array<i64: 128, 128>}, {transform_indices = @transform_1, window_bounds = array<i64: 128, 128>}, {transform_indices = @transform_2, window_bounds = array<i64: 128, 128>}, {pipeline_mode = #tpu.pipeline_mode<synchronous>, transform_indices = @transform_3, window_bounds = array<i64: 1, 128>}, {transform_indices = @transform_4, window_bounds = array<i64: 128, 128>}]} {
    %c0_i32 = arith.constant 0 : i32
    %0 = arith.cmpi eq, %arg1, %c0_i32 : i32
    %1 = arith.extui %0 : i1 to i32
    %c0_i32_0 = arith.constant 0 : i32
    %2 = arith.cmpi ne, %1, %c0_i32_0 : i32
    scf.if %2 {
      %cst_10 = arith.constant 0.000000e+00 : f32
      %12 = vector.broadcast %cst_10 : f32 to vector<128x128xf32>
      %c0_11 = arith.constant 0 : index
      %c0_12 = arith.constant 0 : index
      %13 = vector.load %arg7[%c0_11, %c0_12] : memref<128x128xf32, #tpu.memory_space<vmem>>, vector<128x128xf32>
      tpu.vector_store %arg7[%c0_11, %c0_12], %12 {strides = array<i32>} : memref<128x128xf32, #tpu.memory_space<vmem>>, vector<128x128xf32>,
    } else {
    }
    %c0 = arith.constant 0 : index
    %c0_1 = arith.constant 0 : index
    %3 = vector.load %arg7[%c0, %c0_1] : memref<128x128xf32, #tpu.memory_space<vmem>>, vector<128x128xf32>
    %c0_2 = arith.constant 0 : index
    %c0_3 = arith.constant 0 : index
    %4 = vector.load %arg2[%c0_2, %c0_3] : memref<128x128xbf16, #tpu.memory_space<vmem>>, vector<128x128xbf16>
    %c0_4 = arith.constant 0 : index
    %c0_5 = arith.constant 0 : index
    %5 = vector.load %arg3[%c0_4, %c0_5] : memref<128x128xbf16, #tpu.memory_space<vmem>>, vector<128x128xbf16>
    %cst = arith.constant dense<0.000000e+00> : vector<128x128xf32>
    %6 = tpu.matmul %4, %5, %cst {dimension_numbers = #tpu.dot_dimension_numbers<[1], [0], [0], [1], [0, 0, 1, 1], [], []>} : vector<128x128xbf16>, vector<128x128xbf16>, vector<128x128xf32> -> vector<128x128xf32>
    %7 = arith.addf %3, %6 : vector<128x128xf32>
    %c0_6 = arith.constant 0 : index
    %c0_7 = arith.constant 0 : index
    %8 = vector.load %arg7[%c0_6, %c0_7] : memref<128x128xf32, #tpu.memory_space<vmem>>, vector<128x128xf32>
    tpu.vector_store %arg7[%c0_6, %c0_7], %7 {strides = array<i32>} : memref<128x128xf32, #tpu.memory_space<vmem>>, vector<128x128xf32>,
    %c0_i32_8 = arith.constant 0 : i32
    %9 = arith.cmpi eq, %arg1, %c0_i32_8 : i32
    %10 = arith.extui %9 : i1 to i32
    %c0_i32_9 = arith.constant 0 : i32
    %11 = arith.cmpi ne, %10, %c0_i32_9 : i32
    scf.if %11 {
      %c0_10 = arith.constant 0 : index
      %c0_11 = arith.constant 0 : index
      %12 = vector.load %arg7[%c0_10, %c0_11] : memref<128x128xf32, #tpu.memory_space<vmem>>, vector<128x128xf32>
      %13 = vector.extract_strided_slice %12 {offsets = [0, 16], sizes = [128, 1], strides = [1, 1]} : vector<128x128xf32> to vector<128x1xf32>
      %cst_12 = arith.constant 1.000000e+00 : f32
      %14 = vector.broadcast %cst_12 : f32 to vector<128x1xf32>
      %15 = arith.maximumf %13, %14 : vector<128x1xf32>
      %16 = tpu.reciprocal %15 {approx = true} : vector<128x1xf32> -> vector<128x1xf32>
      %cst_13 = arith.constant 0.000000e+00 : f32
      %17 = vector.broadcast %cst_13 : f32 to vector<128x1xf32>
      %18 = arith.cmpf ogt, %13, %17 : vector<128x1xf32>
      %19 = vector.broadcast %16 : vector<128x1xf32> to vector<128x128xf32>
      %20 = arith.mulf %12, %19 : vector<128x128xf32>
      %c0_14 = arith.constant 0 : index
      %c0_15 = arith.constant 0 : index
      %21 = vector.load %arg4[%c0_14, %c0_15] : memref<128x128xbf16, #tpu.memory_space<vmem>>, vector<128x128xbf16>
      %22 = arith.extf %21 : vector<128x128xbf16> to vector<128x128xf32>
      %23 = vector.shape_cast %18 : vector<128x1xi1> to vector<128x1xi1>
      %24 = vector.broadcast %23 : vector<128x1xi1> to vector<128x128xi1>
      %25 = arith.select %24, %20, %22 : vector<128x128xi1>, vector<128x128xf32>
      %c0_16 = arith.constant 0 : index
      %c0_17 = arith.constant 0 : index
      %26 = vector.load %arg5[%c0_16, %c0_17] : memref<1x128xf32, #tpu.memory_space<vmem>>, vector<1x128xf32>
      %27 = vector.broadcast %26 : vector<1x128xf32> to vector<128x128xf32>
      %28 = arith.addf %25, %27 : vector<128x128xf32>
      %c0_18 = arith.constant 0 : index
      %c0_19 = arith.constant 0 : index
      %29 = vector.load %arg6[%c0_18, %c0_19] : memref<128x128xf32, #tpu.memory_space<vmem>>, vector<128x128xf32>
      tpu.vector_store %arg6[%c0_18, %c0_19], %28 {strides = array<i32>} : memref<128x128xf32, #tpu.memory_space<vmem>>, vector<128x128xf32>,
    } else {
    }
    return
  }
  func.func @transform_0(%arg0: i32, %arg1: i32) -> (i32, i32) {
    %c0_i32 = arith.constant 0 : i32
    return %arg0, %arg1 : i32, i32
  }
  func.func @transform_1(%arg0: i32, %arg1: i32) -> (i32, i32) {
    %c0_i32 = arith.constant 0 : i32
    %c0_i32_0 = arith.constant 0 : i32
    return %arg1, %c0_i32 : i32, i32
  }
  func.func @transform_2(%arg0: i32, %arg1: i32) -> (i32, i32) {
    %c0_i32 = arith.constant 0 : i32
    %c0_i32_0 = arith.constant 0 : i32
    return %arg0, %c0_i32 : i32, i32
  }
  func.func @transform_3(%arg0: i32, %arg1: i32) -> (i32, i32) {
    %c0_i32 = arith.constant 0 : i32
    %c0_i32_0 = arith.constant 0 : i32
    %c0_i32_1 = arith.constant 0 : i32
    return %c0_i32, %c0_i32_0 : i32, i32
  }
  func.func @transform_4(%arg0: i32, %arg1: i32) -> (i32, i32) {
    %c0_i32 = arith.constant 0 : i32
    %c0_i32_0 = arith.constant 0 : i32
    return %arg0, %c0_i32 : i32, i32
  }
}

</mosaic_0001>

<bundles_post_ra>
// kernel: tpu_custom_call.1
= control target key start
LH: loop header
LB: loop body
LE: loop exit
PB: predicated region body
PF: predicated region fallthrough
CT: control target
= control target key end

     0   :  { %9 = vsyncpa [#allocation4], 0  ;;  %s1215_s0 = inlined_call_operand.hbm [shape: bf16[128,128], index: 0, kind: input, shape index: {}]   ;;  %s1216_s1 = inlined_call_operand.hbm [shape: bf16[128,128], index: 1, kind: input, shape index: {}]   ;;  %s1217_s2 = inlined_call_operand.hbm [shape: bf16[128,128], index: 2, kind: input, shape index: {}]   ;;  %s1218_s3 = inlined_call_operand.vmem [shape: f32[1,128], index: 3, kind: input, shape index: {}]   ;;  %s1219_s4 = inlined_call_operand.hbm [shape: f32[128,128], index: 4, kind: output, shape index: {}]  }
   0x1   :  { %10 = vsyncpa [#allocation7], 0 }
   0x2   :  { %11 = vsyncpa [#allocation5], 0  ;;  %s975_s15 = smov [#allocation6]   ;;  %s976_s17 = smov [#allocation3]  }
   0x3   :  { %s29_s16 = sshll.u32 %s975_s15, 4  ;;  %s17_s18 = sshll.u32 %s976_s17, 4  ;;  %s30_s16 = int_to_ptr.vmem [resolvable:$true] %s29_s16  ;;  %s1010_s18 = int_to_ptr.vmem [resolvable:$true] %s17_s18 }
   0x4   :  { %s881_s21 = scalar_lea.hbm %s1216_s1, 1024 }
   0x5   :  { %p882_p0 = scmp.ne.s32.totalorder %s1216_s1, %s881_s21  ;;  %p885_p1 = scmp.lt.u32.totalorder %s881_s21, %s1216_s1 }
   0x7   :  { %p887_p2 = pnand %p885_p1, %p882_p0 }
   0x9   :  { %890 = shalt.err (!%p887_p2)
}
   0xa   :  { %s891_s26 = scalar_lea.vmem %s30_s16, 1024  ;;  %p896_p4 = scmp.lt.s32.totalorder %s30_s16, %s30_s16 }
   0xb   :  { %p892_p3 = scmp.ne.s32.totalorder %s30_s16, %s891_s26  ;;  %p897_p5 = scmp.lt.s32.totalorder %s891_s26, %s891_s26 }
   0xd   :  { %p898_p6 = por %p897_p5, %p896_p4 }
   0xf   :  { %p899_p7 = pnand %p898_p6, %p892_p3 }
  0x11   :  { %902 = shalt.err (!%p899_p7)
}
  0x12   :  { %s977_s27 = smov 64   ;;  %s978_s28 = smov 4  }
  0x13   :  { %35 = dma.hbm_to_vmem [thread:$0]  %s1216_s1, 1024, %s30_s16, [#allocation7], %s977_s27, %s977_s27, %s978_s28  }
  0x14   :  { %s903_s7 = scalar_lea.hbm %s1215_s0, 1024 }
  0x15   :  { %p904_p8 = scmp.ne.s32.totalorder %s1215_s0, %s903_s7  ;;  %p907_p9 = scmp.lt.u32.totalorder %s903_s7, %s1215_s0 }
  0x17   :  { %p909_p10 = pnand %p907_p9, %p904_p8 }
  0x19   :  { %912 = shalt.err (!%p909_p10)
}
  0x1a   :  { %s913_s12 = scalar_lea.vmem %s1010_s18, 1024  ;;  %p918_p12 = scmp.lt.s32.totalorder %s1010_s18, %s1010_s18 }
  0x1b   :  { %p914_p11 = scmp.ne.s32.totalorder %s1010_s18, %s913_s12  ;;  %p919_p13 = scmp.lt.s32.totalorder %s913_s12, %s913_s12 }
  0x1d   :  { %p920_p0 = por %p919_p13, %p918_p12 }
  0x1f   :  { %p921_p1 = pnand %p920_p0, %p914_p11 }
  0x21   :  { %924 = shalt.err (!%p921_p1)
}
  0x22   :  { %23 = dma.hbm_to_vmem [thread:$0]  %s1215_s0, 1024, %s1010_s18, [#allocation4], %s977_s27, %s977_s27, %s978_s28  }
  0x23   :  { %s979_s14 = smov [#allocation8]   ;;  %s925_s19 = scalar_lea.hbm %s1217_s2, 1024 }
  0x24   :  { %s41_s15 = sshll.u32 %s979_s14, 4  ;;  %p926_p2 = scmp.ne.s32.totalorder %s1217_s2, %s925_s19  ;;  %s42_s15 = int_to_ptr.vmem [resolvable:$true] %s41_s15 }
  0x25   :  { %p929_p3 = scmp.lt.u32.totalorder %s925_s19, %s1217_s2 }
  0x27   :  { %p931_p4 = pnand %p929_p3, %p926_p2 }
  0x29   :  { %934 = shalt.err (!%p931_p4)
}
  0x2a   :  { %s935_s24 = scalar_lea.vmem %s42_s15, 1024  ;;  %p940_p6 = scmp.lt.s32.totalorder %s42_s15, %s42_s15 }
  0x2b   :  { %p936_p5 = scmp.ne.s32.totalorder %s42_s15, %s935_s24  ;;  %p941_p7 = scmp.lt.s32.totalorder %s935_s24, %s935_s24 }
  0x2d   :  { %p942_p8 = por %p941_p7, %p940_p6 }
  0x2f   :  { %p943_p9 = pnand %p942_p8, %p936_p5 }
  0x31   :  { %946 = shalt.err (!%p943_p9)
}
  0x32   :  { %47 = dma.hbm_to_vmem [thread:$0]  %s1217_s2, 1024, %s42_s15, [#allocation7], %s977_s27, %s977_s27, %s978_s28  }
  0x33   :  { %969 = dma.done.wait [#allocation4], 1024  }
  0x34   :  { %970 = vsyncadd [#allocation4], 4294966272 }
  0x35   :  { %971 = dma.done.wait [#allocation7], 2048  }
  0x36   :  { %972 = vsyncadd [#allocation7], 4294965248  ;;  %v833_v0 = vld [vmem:[#allocation6] sm:$0xff]   ;;  %v834_v1 = vld [vmem:[#allocation6 + $0x8] sm:$0xff]   ;;  %v980_v16 = vmov 16   ;;  %v981_v23 = vmov 0  }
  0x37   :  { %773 = vmatprep.subr.bf16.mxu0 %v833_v0  ;;  %805 = vmatprep.subr.bf16.mxu1 %v833_v0  ;;  %v835_v2 = vld [vmem:[#allocation6 + $0x10] sm:$0xff]   ;;  %v836_v3 = vld [vmem:[#allocation6 + $0x18] sm:$0xff]   ;;  %v841_v4 = vld [vmem:[#allocation3] sm:$0xff]  }
  0x38   :  { %774 = vmatpush3.bf16.msra.mxu0 %v833_v0  ;;  %813 = vmatpush3.bf16.msra.mxu1 %v833_v0  ;;  %v843_v5 = vld [vmem:[#allocation3 + $0x20] sm:$0xff]   ;;  %v838_v7 = vld [vmem:[#allocation6 + $0x28] sm:$0xff]   ;;  %v839_v8 = vld [vmem:[#allocation6 + $0x30] sm:$0xff]  }
  0x39   :  { %775 = vmatprep.subr.bf16.mxu0 %v834_v1  ;;  %806 = vmatprep.subr.bf16.mxu1 %v834_v1  ;;  %v837_v6 = vld [vmem:[#allocation6 + $0x20] sm:$0xff]   ;;  %v840_v9 = vld [vmem:[#allocation6 + $0x38] sm:$0xff]   ;;  %v842_v10 = vld [vmem:[#allocation3 + $0x8] sm:$0xff]  }
  0x3a   :  { %789 = vmatprep.mubr.bf16.mxu0 %v841_v4  ;;  %797 = vmatprep.mubr.bf16.mxu1 %v843_v5  ;;  %v844_v11 = vld [vmem:[#allocation3 + $0x28] sm:$0xff]   ;;  %v845_v12 = vld [vmem:[#allocation3 + $0x10] sm:$0xff]   ;;  %v846_v14 = vld [vmem:[#allocation3 + $0x18] sm:$0xff]  }
  0x3b   :  { %v847_v13 = vld [vmem:[#allocation3 + $0x30] sm:$0xff]   ;;  %v848_v15 = vld [vmem:[#allocation3 + $0x38] sm:$0xff]   ;;  %831 = vset.pattern.permute.xlu0 %v980_v16  ;;  %832 = vset.pattern.permute.xlu1 %v980_v16 }
  0x3c   :  { %776 = vmatpush3.bf16.msra.mxu0 %v834_v1  ;;  %814 = vmatpush3.bf16.msra.mxu1 %v834_v1 }
  0x3d   :  { %777 = vmatprep.subr.bf16.mxu0 %v835_v2  ;;  %807 = vmatprep.subr.bf16.mxu1 %v835_v2 }
  0x40   :  { %778 = vmatpush3.bf16.msra.mxu0 %v835_v2  ;;  %815 = vmatpush3.bf16.msra.mxu1 %v835_v2 }
  0x41   :  { %779 = vmatprep.subr.bf16.mxu0 %v836_v3  ;;  %808 = vmatprep.subr.bf16.mxu1 %v836_v3 }
  0x44   :  { %780 = vmatpush3.bf16.msra.mxu0 %v836_v3  ;;  %816 = vmatpush3.bf16.msra.mxu1 %v836_v3 }
  0x45   :  { %781 = vmatprep.subr.bf16.mxu0 %v837_v6  ;;  %809 = vmatprep.subr.bf16.mxu1 %v837_v6 }
  0x48   :  { %782 = vmatpush3.bf16.msra.mxu0 %v837_v6  ;;  %817 = vmatpush3.bf16.msra.mxu1 %v837_v6 }
  0x49   :  { %783 = vmatprep.subr.bf16.mxu0 %v838_v7  ;;  %810 = vmatprep.subr.bf16.mxu1 %v838_v7 }
  0x4c   :  { %784 = vmatpush3.bf16.msra.mxu0 %v838_v7  ;;  %818 = vmatpush3.bf16.msra.mxu1 %v838_v7 }
  0x4d   :  { %785 = vmatprep.subr.bf16.mxu0 %v839_v8  ;;  %811 = vmatprep.subr.bf16.mxu1 %v839_v8 }
  0x50   :  { %786 = vmatpush3.bf16.msra.mxu0 %v839_v8  ;;  %819 = vmatpush3.bf16.msra.mxu1 %v839_v8 }
  0x51   :  { %787 = vmatprep.subr.bf16.mxu0 %v840_v9  ;;  %812 = vmatprep.subr.bf16.mxu1 %v840_v9 }
  0x54   :  { %788 = vmatpush3.bf16.msra.mxu0 %v840_v9  ;;  %820 = vmatpush3.bf16.msra.mxu1 %v840_v9 }
  0x57   :  { %790 = vmatmul.mubr.bf16.vlgmr.msra.gmra.mrb[0].mxu0 %v842_v10  ;;  %798 = vmatmul.mubr.bf16.vlgmr.msra.gmra.mrb[0].mxu1 %v844_v11 }
  0x58   :  { %793 = vmatprep.mubr.bf16.mxu0 %v845_v12  ;;  %801 = vmatprep.mubr.bf16.mxu1 %v847_v13 }
  0x5f   :  { %794 = vmatmul.mubr.bf16.gmra.mrb[4].mxu0 %v846_v14  ;;  %802 = vmatmul.mubr.bf16.gmra.mrb[4].mxu1 %v848_v15 }
 0x12a   :  { %v1062_v17 = vpop.f32.mrb[0].mxu0  ;;  %v1064_v18 = vpop.f32.mrb[0].mxu1 }
 0x12b   :  { %v1066_v19 = vpop.f32.mrb[1].mxu0  ;;  %v1068_v20 = vpop.f32.mrb[1].mxu1  ;;  %vm406_vm0 = vcmp.gt.f32.partialorder %v1062_v17, 0.0  ;;  %vm414_vm1 = vcmp.gt.f32.partialorder %v1064_v18, 0.0  ;;  %v374_v34 = vmax.f32 %v1062_v17, 1.0  ;;  %v382_v42 = vmax.f32 %v1064_v18, 1.0 }
 0x12c   :  { %v1072_v21 = vpop.f32.mrb[2].mxu0  ;;  %v1074_v22 = vpop.f32.mrb[2].mxu1  ;;  %v550_v24 = vsel %vm406_vm0, 1, %v981_v23  ;;  %v558_v28 = vsel %vm414_vm1, 1, %v981_v23  ;;  %vm404_vm4 = vcmp.gt.f32.partialorder %v1066_v19, 0.0  ;;  %vm412_vm6 = vcmp.gt.f32.partialorder %v1068_v20, 0.0 }
 0x12d   :  { %571 = vperm.xlu0 %831, %v550_v24   ;;  %v1077_v25 = vpop.f32.mrb[3].mxu0  ;;  %v1079_v26 = vpop.f32.mrb[3].mxu1  ;;  %vm407_vm2 = vcmp.gt.f32.partialorder %v1072_v21, 0.0  ;;  %vm415_vm3 = vcmp.gt.f32.partialorder %v1074_v22, 0.0  ;;  %v548_v35 = vsel %vm404_vm4, 1, %v981_v23  ;;  %849 = vrcp.f32 %v374_v34 }
 0x12e   :  { %v551_v27 = vsel %vm407_vm2, 1, %v981_v23  ;;  %v559_v29 = vsel %vm415_vm3, 1, %v981_v23  ;;  %vm405_vm5 = vcmp.gt.f32.partialorder %v1077_v25, 0.0  ;;  %vm413_vm7 = vcmp.gt.f32.partialorder %v1079_v26, 0.0 }
 0x12f   :  { %574 = vperm.xlu1 %832, %v551_v27   ;;  %v549_v40 = vsel %vm405_vm5, 1, %v981_v23  ;;  %v556_v41 = vsel %vm412_vm6, 1, %v981_v23  ;;  %v557_v43 = vsel %vm413_vm7, 1, %v981_v23  ;;  %v372_v45 = vmax.f32 %v1066_v19, 1.0 }
 0x130   :  { %851 = vrcp.f32 %v382_v42  ;;  %v375_v47 = vmax.f32 %v1072_v21, 1.0  ;;  %v380_v50 = vmax.f32 %v1068_v20, 1.0  ;;  %v383_v52 = vmax.f32 %v1074_v22, 1.0 }
 0x131   :  { %595 = vperm.xlu0 %831, %v558_v28   ;;  %853 = vrcp.f32 %v372_v45  ;;  %v373_v53 = vmax.f32 %v1077_v25, 1.0  ;;  %v381_v56 = vmax.f32 %v1079_v26, 1.0  ;;  %v750_v45 = vld [vmem:[#allocation8 + $0x8] sm:$0xff]  }
 0x132   :  { %v1087_v30 = vpop.f32.mrb[4].mxu0  ;;  %v1089_v31 = vpop.f32.mrb[4].mxu1  ;;  %855 = vrcp.f32 %v375_v47  ;;  %v724_v47 = vunpack.c.l.bf16 %v750_v45 }
 0x133   :  { %598 = vperm.xlu1 %832, %v559_v29   ;;  %v1092_v32 = vpop.f32.mrb[5].mxu0  ;;  %v1094_v33 = vpop.f32.mrb[5].mxu1  ;;  %vm410_vm8 = vcmp.gt.f32.partialorder %v1087_v30, 0.0  ;;  %857 = vrcp.f32 %v380_v50  ;;  %v378_v57 = vmax.f32 %v1087_v30, 1.0  ;;  %v386_v62 = vmax.f32 %v1089_v31, 1.0 }
 0x134   :  { %v1098_v36 = vpop.f32.mrb[6].mxu0  ;;  %v1100_v37 = vpop.f32.mrb[6].mxu1  ;;  %v554_v44 = vsel %vm410_vm8, 1, %v981_v23  ;;  %vm408_vm10 = vcmp.gt.f32.partialorder %v1092_v32, 0.0  ;;  %vm416_vm11 = vcmp.gt.f32.partialorder %v1094_v33, 0.0  ;;  %859 = vrcp.f32 %v383_v52 }
 0x135   :  { %565 = vperm.xlu0 %831, %v548_v35   ;;  %v1103_v38 = vpop.f32.mrb[7].mxu0  ;;  %v1105_v39 = vpop.f32.mrb[7].mxu1  ;;  %vm411_vm9 = vcmp.gt.f32.partialorder %v1098_v36, 0.0  ;;  %v552_v48 = vsel %vm408_vm10, 1, %v981_v23  ;;  %v560_v51 = vsel %vm416_vm11, 1, %v981_v23  ;;  %861 = vrcp.f32 %v373_v53 }
 0x136   :  { %v555_v46 = vsel %vm411_vm9, 1, %v981_v23  ;;  %vm409_vm12 = vcmp.gt.f32.partialorder %v1103_v38, 0.0  ;;  %vm417_vm13 = vcmp.gt.f32.partialorder %v1105_v39, 0.0  ;;  %863 = vrcp.f32 %v381_v56 }
 0x137   :  { %568 = vperm.xlu1 %832, %v549_v40   ;;  %v850_v49 = vpop.eup %849  ;;  %v553_v54 = vsel %vm409_vm12, 1, %v981_v23  ;;  %v561_v58 = vsel %vm417_vm13, 1, %v981_v23  ;;  %v379_v60 = vmax.f32 %v1098_v36, 1.0  ;;  %865 = vrcp.f32 %v378_v57  ;;  %v719_v57 = vld [vmem:[#allocation8] sm:$0xff]  }
 0x138   :  { %v387_v0 = vmax.f32 %v1100_v37, 1.0  ;;  %v376_v2 = vmax.f32 %v1092_v32, 1.0  ;;  %v377_v4 = vmax.f32 %v1103_v38, 1.0  ;;  %v384_v6 = vmax.f32 %v1094_v33, 1.0 }
 0x139   :  { %589 = vperm.xlu0 %831, %v556_v41   ;;  %867 = vrcp.f32 %v379_v60  ;;  %v385_v8 = vmax.f32 %v1105_v39, 1.0  ;;  %vm418_vm14 = vcmp.gt.f32.partialorder %v1089_v31, 0.0  ;;  %vm419_vm15 = vcmp.gt.f32.partialorder %v1100_v37, 0.0 }
 0x13a   :  { %v852_v55 = vpop.eup %851  ;;  %869 = vrcp.f32 %v386_v62  ;;  %v562_v16 = vsel %vm418_vm14, 1, %v981_v23  ;;  %v563_v24 = vsel %vm419_vm15, 1, %v981_v23 }
 0x13b   :  { %592 = vperm.xlu1 %832, %v557_v43   ;;  %v854_v59 = vpop.eup %853  ;;  %871 = vrcp.f32 %v387_v0 }
 0x13c   :  { %v856_v61 = vpop.eup %855  ;;  %873 = vrcp.f32 %v376_v2 }
 0x13d   :  { %583 = vperm.xlu0 %831, %v554_v44   ;;  %v858_v63 = vpop.eup %857  ;;  %875 = vrcp.f32 %v377_v4 }
 0x13e   :  { %v860_v1 = vpop.eup %859  ;;  %877 = vrcp.f32 %v384_v6 }
 0x13f   :  { %586 = vperm.xlu1 %832, %v555_v46   ;;  %v862_v3 = vpop.eup %861  ;;  %879 = vrcp.f32 %v385_v8 }
 0x140   :  { %v864_v5 = vpop.eup %863 }
 0x141   :  { %577 = vperm.xlu0 %831, %v552_v48   ;;  %v866_v7 = vpop.eup %865  ;;  %v1155_v48 = vld [vmem:[%s1218_s3] ss:$0 sm:$0xff]  ;;  %s982_s3 = smov [#allocation9]  }
 0x142   :  { %s688_s26 = sshll.u32 %s982_s3, 4  ;;  %s689_s26 = int_to_ptr.vmem [resolvable:$true] %s688_s26 }
 0x143   :  { %432 = vperm.xlu1 %832, %v850_v49   ;;  %v868_v9 = vpop.eup %867  ;;  %s947_s27 = scalar_lea.vmem %s689_s26, 2048  ;;  %p952_p11 = scmp.lt.s32.totalorder %s689_s26, %s689_s26 }
 0x144   :  { %v870_v10 = vpop.eup %869  ;;  %p948_p10 = scmp.ne.s32.totalorder %s689_s26, %s947_s27  ;;  %p953_p12 = scmp.lt.s32.totalorder %s947_s27, %s947_s27 }
 0x145   :  { %601 = vperm.xlu0 %831, %v560_v51   ;;  %v872_v11 = vpop.eup %871  ;;  %v754_v51 = vld [vmem:[#allocation8 + $0x28] sm:$0xff]  }
 0x146   :  { %v874_v12 = vpop.eup %873  ;;  %p954_p13 = por %p953_p12, %p952_p11 }
 0x147   :  { %580 = vperm.xlu1 %832, %v553_v54   ;;  %v876_v13 = vpop.eup %875 }
 0x148   :  { %v878_v14 = vpop.eup %877  ;;  %p955_p0 = pnand %p954_p13, %p948_p10 }
 0x149   :  { %472 = vperm.xlu0 %831, %v852_v55   ;;  %v880_v15 = vpop.eup %879  ;;  %v740_v55 = vunpack.c.l.bf16 %v754_v51 }
 0x14b   :  { %604 = vperm.xlu1 %832, %v561_v58  }
 0x14d   :  { %422 = vperm.xlu0 %831, %v854_v59  }
 0x14f   :  { %437 = vperm.xlu1 %832, %v856_v61  }
 0x151   :  { %462 = vperm.xlu0 %831, %v858_v63   ;;  %v753_v63 = vld [vmem:[#allocation8 + $0x20] sm:$0xff]  }
 0x153   :  { %477 = vperm.xlu1 %832, %v860_v1   ;;  %v725_v1 = vunpack.c.h.bf16 %v750_v45 }
 0x155   :  { %427 = vperm.xlu0 %831, %v862_v3  }
 0x157   :  { %467 = vperm.xlu1 %832, %v864_v5   ;;  %v736_v5 = vunpack.c.l.bf16 %v753_v63 }
 0x159   :  { %452 = vperm.xlu0 %831, %v866_v7  }
 0x15b   :  { %457 = vperm.xlu1 %832, %v868_v9   ;;  %v741_v9 = vunpack.c.h.bf16 %v754_v51 }
 0x15d   :  { %492 = vperm.xlu0 %831, %v870_v10  }
 0x15f   :  { %497 = vperm.xlu1 %832, %v872_v11  }
 0x161   :  { %442 = vperm.xlu0 %831, %v874_v12  }
 0x163   :  { %447 = vperm.xlu1 %832, %v876_v13   ;;  %v721_v13 = vunpack.c.h.bf16 %v719_v57 }
 0x165   :  { %482 = vperm.xlu0 %831, %v878_v14  }
 0x167   :  { %487 = vperm.xlu1 %832, %v880_v15   ;;  %v752_v15 = vld [vmem:[#allocation8 + $0x18] sm:$0xff]  }
 0x169   :  { %607 = vperm.xlu0 %831, %v562_v16  }
 0x16b   :  { %610 = vperm.xlu1 %832, %v563_v24  }
 0x1ac   :  { %v572_v27 = vpop.permute.xlu0 %571 }
 0x1ad   :  { %vm614_vm0 = vcmp.eq.s32.totalorder %v572_v27, 1 }
 0x1ae   :  { %v575_v28 = vpop.permute.xlu1 %574 }
 0x1af   :  { %vm615_vm3 = vcmp.eq.s32.totalorder %v575_v28, 1 }
 0x1b0   :  { %v596_v29 = vpop.permute.xlu0 %595 }
 0x1b1   :  { %vm622_vm1 = vcmp.eq.s32.totalorder %v596_v29, 1 }
 0x1b2   :  { %v599_v34 = vpop.permute.xlu1 %598 }
 0x1b3   :  { %vm623_vm5 = vcmp.eq.s32.totalorder %v599_v34, 1 }
 0x1b4   :  { %v566_v35 = vpop.permute.xlu0 %565 }
 0x1b5   :  { %vm612_vm2 = vcmp.eq.s32.totalorder %v566_v35, 1  ;;  %v732_v35 = vunpack.c.l.bf16 %v752_v15 }
 0x1b6   :  { %v1142_v40 = vpop.permute.xlu1 %568 }
 0x1b7   :  { %vm613_vm6 = vcmp.eq.s32.totalorder %v1142_v40, 1 }
 0x1b8   :  { %v590_v41 = vpop.permute.xlu0 %589 }
 0x1b9   :  { %vm620_vm4 = vcmp.eq.s32.totalorder %v590_v41, 1 }
 0x1ba   :  { %v1144_v42 = vpop.permute.xlu1 %592 }
 0x1bb   :  { %vm621_vm7 = vcmp.eq.s32.totalorder %v1144_v42, 1 }
 0x1bc   :  { %v1146_v43 = vpop.permute.xlu0 %583 }
 0x1bd   :  { %vm618_vm8 = vcmp.eq.s32.totalorder %v1146_v43, 1 }
 0x1be   :  { %v1148_v44 = vpop.permute.xlu1 %586 }
 0x1bf   :  { %vm619_vm9 = vcmp.eq.s32.totalorder %v1148_v44, 1 }
 0x1c0   :  { %v1150_v46 = vpop.permute.xlu0 %577 }
 0x1c1   :  { %vm616_vm10 = vcmp.eq.s32.totalorder %v1150_v46, 1 }
 0x1c2   :  { %v433_v23 = vpop.permute.xlu1 %432 }
 0x1c3   :  { %v502_v49 = vmul.f32 %v1062_v17, %v433_v23  ;;  %v720_v17 = vunpack.c.l.bf16 %v719_v57  ;;  %v755_v57 = vld [vmem:[#allocation8 + $0x30] sm:$0xff]  }
 0x1c4   :  { %v1158_v50 = vpop.permute.xlu0 %601 }
 0x1c5   :  { %v630_v52 = vsel %vm614_vm0, %v502_v49, %v724_v47  ;;  %v733_v47 = vunpack.c.h.bf16 %v752_v15  ;;  %vm624_vm12 = vcmp.eq.s32.totalorder %v1158_v50, 1 }
 0x1c6   :  { %v653_v53 = vadd.f32 %v1155_v48, %v630_v52  ;;  %v1161_v54 = vpop.permute.xlu1 %580  ;;  %v751_v52 = vld [vmem:[#allocation8 + $0x10] sm:$0xff]  }
 0x1c7   :  { %v728_v43 = vunpack.c.l.bf16 %v751_v52  ;;  %vm617_vm11 = vcmp.eq.s32.totalorder %v1161_v54, 1 }
 0x1c8   :  { %669 = vst [vmem:[#allocation9 + $0x10] sm:$0xff] %v653_v53  ;;  %v473_v56 = vpop.permute.xlu0 %472 }
 0x1c9   :  { %v510_v58 = vmul.f32 %v1064_v18, %v473_v56 }
 0x1ca   :  { %v1164_v59 = vpop.permute.xlu1 %604 }
 0x1cb   :  { %v638_v60 = vsel %vm622_vm1, %v510_v58, %v740_v55  ;;  %vm625_vm13 = vcmp.eq.s32.totalorder %v1164_v59, 1 }
 0x1cc   :  { %v661_v61 = vadd.f32 %v1155_v48, %v638_v60  ;;  %v423_v62 = vpop.permute.xlu0 %422  ;;  %v729_v60 = vunpack.c.h.bf16 %v751_v52 }
 0x1cd   :  { %v500_v0 = vmul.f32 %v423_v62, %v1066_v19  ;;  %v756_v62 = vld [vmem:[#allocation8 + $0x38] sm:$0xff]  }
 0x1ce   :  { %677 = vst [vmem:[#allocation9 + $0x50] sm:$0xff] %v661_v61  ;;  %v438_v2 = vpop.permute.xlu1 %437  ;;  %v744_v61 = vunpack.c.l.bf16 %v755_v57 }
 0x1cf   :  { %v628_v3 = vsel %vm612_vm2, %v500_v0, %v720_v17  ;;  %v503_v4 = vmul.f32 %v1072_v21, %v438_v2 }
 0x1d0   :  { %v651_v18 = vadd.f32 %v1155_v48, %v628_v3  ;;  %v463_v6 = vpop.permute.xlu0 %462  ;;  %v745_v3 = vunpack.c.h.bf16 %v755_v57 }
 0x1d1   :  { %v631_v7 = vsel %vm615_vm3, %v503_v4, %v725_v1  ;;  %v508_v8 = vmul.f32 %v463_v6, %v1068_v20  ;;  %v737_v20 = vunpack.c.h.bf16 %v753_v63  ;;  %v748_v4 = vunpack.c.l.bf16 %v756_v62 }
 0x1d2   :  { %667 = vst [vmem:[#allocation9] sm:$0xff] %v651_v18  ;;  %v654_v19 = vadd.f32 %v1155_v48, %v631_v7  ;;  %v478_v10 = vpop.permute.xlu1 %477 }
 0x1d3   :  { %v636_v11 = vsel %vm620_vm4, %v508_v8, %v736_v5  ;;  %v511_v12 = vmul.f32 %v1074_v22, %v478_v10 }
 0x1d4   :  { %670 = vst [vmem:[#allocation9 + $0x18] sm:$0xff] %v654_v19  ;;  %v659_v21 = vadd.f32 %v1155_v48, %v636_v11  ;;  %v428_v14 = vpop.permute.xlu0 %427 }
 0x1d5   :  { %v639_v16 = vsel %vm623_vm5, %v511_v12, %v741_v9  ;;  %v501_v24 = vmul.f32 %v428_v14, %v1077_v25 }
 0x1d6   :  { %675 = vst [vmem:[#allocation9 + $0x40] sm:$0xff] %v659_v21  ;;  %v662_v27 = vadd.f32 %v1155_v48, %v639_v16  ;;  %v468_v28 = vpop.permute.xlu1 %467 }
 0x1d7   :  { %v629_v29 = vsel %vm613_vm6, %v501_v24, %v721_v13  ;;  %v509_v22 = vmul.f32 %v468_v28, %v1079_v26 }
 0x1d8   :  { %678 = vst [vmem:[#allocation9 + $0x58] sm:$0xff] %v662_v27  ;;  %v652_v34 = vadd.f32 %v1155_v48, %v629_v29  ;;  %v453_v41 = vpop.permute.xlu0 %452 }
 0x1d9   :  { %v637_v45 = vsel %vm621_vm7, %v509_v22, %v737_v20  ;;  %v506_v25 = vmul.f32 %v1087_v30, %v453_v41 }
 0x1da   :  { %668 = vst [vmem:[#allocation9 + $0x8] sm:$0xff] %v652_v34  ;;  %v660_v40 = vadd.f32 %v1155_v48, %v637_v45  ;;  %v458_v23 = vpop.permute.xlu1 %457 }
 0x1db   :  { %v634_v49 = vsel %vm618_vm8, %v506_v25, %v732_v35  ;;  %v507_v26 = vmul.f32 %v1098_v36, %v458_v23 }
 0x1dc   :  { %676 = vst [vmem:[#allocation9 + $0x48] sm:$0xff] %v660_v40  ;;  %v657_v42 = vadd.f32 %v1155_v48, %v634_v49  ;;  %v493_v51 = vpop.permute.xlu0 %492 }
 0x1dd   :  { %v635_v53 = vsel %vm619_vm9, %v507_v26, %v733_v47  ;;  %v514_v54 = vmul.f32 %v1089_v31, %v493_v51 }
 0x1de   :  { %673 = vst [vmem:[#allocation9 + $0x30] sm:$0xff] %v657_v42  ;;  %v658_v30 = vadd.f32 %v1155_v48, %v635_v53  ;;  %v498_v55 = vpop.permute.xlu1 %497 }
 0x1df   :  { %v515_v50 = vmul.f32 %v1100_v37, %v498_v55 }
 0x1e0   :  { %674 = vst [vmem:[#allocation9 + $0x38] sm:$0xff] %v658_v30  ;;  %v443_v56 = vpop.permute.xlu0 %442 }
 0x1e1   :  { %v504_v58 = vmul.f32 %v443_v56, %v1092_v32 }
 0x1e2   :  { %v448_v36 = vpop.permute.xlu1 %447 }
 0x1e3   :  { %v632_v44 = vsel %vm616_vm10, %v504_v58, %v728_v43  ;;  %v505_v17 = vmul.f32 %v448_v36, %v1103_v38 }
 0x1e4   :  { %v655_v63 = vadd.f32 %v1155_v48, %v632_v44  ;;  %v483_v0 = vpop.permute.xlu0 %482 }
 0x1e5   :  { %v633_v1 = vsel %vm617_vm11, %v505_v17, %v729_v60  ;;  %v512_v2 = vmul.f32 %v483_v0, %v1094_v33  ;;  %v749_v33 = vunpack.c.h.bf16 %v756_v62 }
 0x1e6   :  { %671 = vst [vmem:[#allocation9 + $0x20] sm:$0xff] %v655_v63  ;;  %v656_v32 = vadd.f32 %v1155_v48, %v633_v1  ;;  %v488_v46 = vpop.permute.xlu1 %487 }
 0x1e7   :  { %v640_v5 = vsel %vm624_vm12, %v512_v2, %v744_v61  ;;  %v513_v38 = vmul.f32 %v488_v46, %v1105_v39 }
 0x1e8   :  { %672 = vst [vmem:[#allocation9 + $0x28] sm:$0xff] %v656_v32  ;;  %v663_v18 = vadd.f32 %v1155_v48, %v640_v5  ;;  %v608_v6 = vpop.permute.xlu0 %607 }
 0x1e9   :  { %v641_v7 = vsel %vm625_vm13, %v513_v38, %v745_v3  ;;  %vm626_vm14 = vcmp.eq.s32.totalorder %v608_v6, 1 }
 0x1ea   :  { %679 = vst [vmem:[#allocation9 + $0x60] sm:$0xff] %v663_v18  ;;  %v664_v8 = vadd.f32 %v1155_v48, %v641_v7  ;;  %v642_v9 = vsel %vm626_vm14, %v514_v54, %v748_v4  ;;  %v611_v19 = vpop.permute.xlu1 %610 }
 0x1eb   :  { %v665_v39 = vadd.f32 %v1155_v48, %v642_v9  ;;  %vm627_vm15 = vcmp.eq.s32.totalorder %v611_v19, 1 }
 0x1ec   :  { %680 = vst [vmem:[#allocation9 + $0x68] sm:$0xff] %v664_v8  ;;  %v643_v31 = vsel %vm627_vm15, %v515_v50, %v749_v33 }
 0x1ed   :  { %681 = vst [vmem:[#allocation9 + $0x70] sm:$0xff] %v665_v39  ;;  %v666_v59 = vadd.f32 %v1155_v48, %v643_v31 }
 0x1ef   :  { %682 = vst [vmem:[#allocation9 + $0x78] sm:$0xff] %v666_v59 }
 0x1f0   :  { %958 = shalt.err (!%p955_p0)
}
 0x1f1   :  { %s959_s30 = scalar_lea.hbm %s1219_s4, 2048 }
 0x1f2   :  { %p960_p1 = scmp.ne.s32.totalorder %s1219_s4, %s959_s30  ;;  %p963_p2 = scmp.lt.u32.totalorder %s959_s30, %s1219_s4 }
 0x1f4   :  { %p965_p3 = pnand %p963_p2, %p960_p1 }
 0x1f6   :  { %968 = shalt.err (!%p965_p3)
}
 0x1f7   :  { %s983_s9 = smov 128   ;;  %s984_s10 = smov 8  }
 0x1f8   :  { %694 = dma.vmem_to_hbm [thread:$0]  %s689_s26, 2048, %s1219_s4, [#allocation5], %s983_s9, %s983_s9, %s984_s10  }
 0x1f9   :  { %973 = dma.done.wait [#allocation5], 2048  }
 0x1fa   :  { %974 = vsyncadd [#allocation5], 4294965248 }
 0x1fb   :  { %698 = vsyncpa [#allocation4], 1 }
 0x1fc   :  { %699 = vsyncpa [#allocation7], 1 }
 0x1fd   :  { %700 = vsyncpa [#allocation5], 1 }

</bundles_post_ra>
